<compile_context>
chip_gen: v6e
topology: v6e:2x2x1
jax: 0.10.0
libtpu: 0.0.40
codegen_flags: <defaults>
</compile_context>

<pallas_src>
import jax
import jax.numpy as jnp
from jax.experimental import pallas as pl
from jax.experimental.pallas import tpu as pltpu


def _round_up(x, m):
    return ((x + m - 1) // m) * m


def _choose_pack(h4, hidden, max_k=128):
    """Largest pack with pack*h4 <= max_k, preferring pack*hidden % 128 == 0."""
    best_dense, best_any = 1, 1
    p = 1
    while p * h4 <= max_k:
        best_any = p
        if (p * hidden) % 128 == 0:
            best_dense = p
        p += 1
    return best_dense if best_dense > 1 else best_any


def pack_temporal_params(w1, b1, w2, b2):
    """Init-time packing: block-diagonal kron(I_pack, W) weights.

    w1: (1, h4), b1: (h4,), w2: (h4, hidden), b2: (hidden,).
    Returns (w1p, b1p, w2p, b2p) with
      w1p: (pack, pack*h4), b1p: (1, pack*h4),
      w2p: (pack*h4, pack*hidden), b2p: (1, pack*hidden).
    """
    f32 = jnp.float32
    h4 = w1.shape[1]
    hidden = w2.shape[1]
    pack = _choose_pack(h4, hidden)

    eye = jnp.eye(pack, dtype=f32)
    w1p = jnp.kron(eye, w1.astype(f32))                            # (pack, pack*h4)
    w2p = jnp.kron(eye, w2.astype(f32))                            # (pack*h4, pack*hidden)
    b1p = jnp.tile(b1.astype(f32).reshape(1, h4), (1, pack))       # (1, pack*h4)
    b2p = jnp.tile(b2.astype(f32).reshape(1, hidden), (1, pack))   # (1, pack*hidden)
    return w1p, b1p, w2p, b2p


def _temporal_encoding_kernel(t_ref, w1_ref, b1_ref, w2_ref, b2_ref, out_ref,
                              *, inv_max_time_delta):
    # t_ref: (rows, pack) tile; row r, col p holds time_delta[r*pack + p].
    tn = jnp.clip(t_ref[...] * jnp.float32(inv_max_time_delta), 0.0, 1.0)

    # First linear, packed block-diagonal: (rows, pack) @ (pack, pack*h4).
    h = jnp.dot(tn, w1_ref[...], preferred_element_type=jnp.float32) + b1_ref[...]
    h = jnp.maximum(h, 0.0)                                        # ReLU

    # Second linear, packed block-diagonal: (rows, pack*h4) @ (pack*h4, pack*H).
    out = jnp.dot(h, w2_ref[...], preferred_element_type=jnp.float32) + b2_ref[...]
    out_ref[...] = out.astype(out_ref.dtype)


def temporal_encoding_packed(time_deltas, w1p, b1p, w2p, b2p, *,
                             max_time_delta=365, tile_n=None):
    """time_deltas: (N,) f32.  Packed params from pack_temporal_params.

    Returns (N, hidden) f32.
    """
    n = time_deltas.shape[0]
    pack = w1p.shape[0]
    ph4 = w1p.shape[1]            # pack * h4
    phid = w2p.shape[1]           # pack * hidden
    hidden = phid // pack

    align = 8 * pack              # packed rows must be a sublane multiple of 8
    if tile_n is None:
        # 2048 packed rows/step: ~1 MiB lane-padded input + pack*hidden*8 KiB
        # output per buffer -> ~10 MiB total for hidden=32/pack=16; big enough
        # that the ~0.35 us per-step overhead is <5% of each step.
        tile_n = 2048 * pack
    tile_n = max(align, _round_up(tile_n, align))

    # Even grid (>= 2 steps) for v7x megacore sharding when N is large enough.
    if n <= align:
        grid = 1
    else:
        grid = max(2, pl.cdiv(n, tile_n))
        if grid % 2:
            grid += 1
    tile_n = max(align, _round_up(pl.cdiv(n, grid), align))
    n_pad = grid * tile_n

    f32 = jnp.float32
    t = time_deltas.astype(f32)
    if n_pad != n:
        t = jnp.pad(t, (0, n_pad - n))       # zero pad: tail rows are finite, sliced off
    t_packed = t.reshape(n_pad // pack, pack)  # free row-major view

    kernel = lambda *refs: _temporal_encoding_kernel(
        *refs, inv_max_time_delta=1.0 / float(max_time_delta))

    out_packed = pl.pallas_call(
        kernel,
        out_shape=jax.ShapeDtypeStruct((n_pad // pack, phid), f32),
        grid_spec=pltpu.PrefetchScalarGridSpec(
            num_scalar_prefetch=0,
            grid=(grid,),
            in_specs=[
                pl.BlockSpec((tile_n // pack, pack), lambda i: (i, 0)),  # deltas
                pl.BlockSpec((pack, ph4), lambda i: (0, 0)),             # W1 packed
                pl.BlockSpec((1, ph4), lambda i: (0, 0)),                # b1 packed
                pl.BlockSpec((ph4, phid), lambda i: (0, 0)),             # W2 packed
                pl.BlockSpec((1, phid), lambda i: (0, 0)),               # b2 packed
            ],
            out_specs=pl.BlockSpec((tile_n // pack, phid), lambda i: (i, 0)),
        ),
        compiler_params=pltpu.CompilerParams(
            dimension_semantics=("parallel",)),
    )(t_packed, w1p, b1p, w2p, b2p)

    # Unpack: (n_pad/pack, pack*hidden) -> (n_pad, hidden) is row-major free.
    out = out_packed.reshape(n_pad, hidden)
    return out[:n]


def temporal_encoding(time_deltas, w1, b1, w2, b2, *, max_time_delta=365,
                      tile_n=None):
    """Convenience wrapper matching the original signature (packs on the fly).

    For hot paths, pack once with pack_temporal_params and call
    temporal_encoding_packed under jax.jit instead.
    """
    w1p, b1p, w2p, b2p = pack_temporal_params(w1, b1, w2, b2)
    return temporal_encoding_packed(time_deltas, w1p, b1p, w2p, b2p,
                                    max_time_delta=max_time_delta,
                                    tile_n=tile_n)


if __name__ == "__main__":
    key = jax.random.PRNGKey(0)
    hidden_channels = 32
    h4 = hidden_channels // 4
    max_time_delta = 365
    n = 200  # deliberately not a tile multiple, to exercise pad + slice

    k_t, k_w1, k_b1, k_w2, k_b2 = jax.random.split(key, 5)
    # Synthetic parameters (shapes per nn.Linear(1, H//4), nn.Linear(H//4, H),
    # stored as (in_features, out_features)).
    w1 = jax.random.normal(k_w1, (1, h4), dtype=jnp.float32) * 0.5
    b1 = jax.random.normal(k_b1, (h4,), dtype=jnp.float32) * 0.1
    w2 = jax.random.normal(k_w2, (h4, hidden_channels), dtype=jnp.float32) * 0.5
    b2 = jax.random.normal(k_b2, (hidden_channels,), dtype=jnp.float32) * 0.1

    # Time deltas in days, including out-of-range values to exercise the clamp.
    time_deltas = jax.random.uniform(k_t, (n,), dtype=jnp.float32,
                                     minval=-50.0, maxval=500.0)

    # Pack weights once (init-time), jit the apply path (packed weights become
    # baked-in constants; per-call work is pad + pallas_call + slice).
    w1p, b1p, w2p, b2p = pack_temporal_params(w1, b1, w2, b2)
    apply_fn = jax.jit(lambda td: temporal_encoding_packed(
        td, w1p, b1p, w2p, b2p, max_time_delta=max_time_delta))

    out = jax.block_until_ready(apply_fn(time_deltas))

    # Pure-JAX reference check.
    tn_ref = jnp.clip(time_deltas / max_time_delta, 0.0, 1.0)[:, None]
    ref = jnp.maximum(tn_ref @ w1 + b1[None, :], 0.0) @ w2 + b2[None, :]
    assert out.shape == (n, hidden_channels)
    assert jnp.allclose(out, ref, atol=1e-4, rtol=1e-4), "mismatch vs reference"

    print("KERNEL_OK")
</pallas_src>

<mosaic_0001>
module attributes {stable_mosaic.version = 11 : i64} {
  func.func @_lambda_(%arg0: i32, %arg1: memref<8x16xf32, #tpu.memory_space<vmem>>, %arg2: memref<16x128xf32, #tpu.memory_space<vmem>>, %arg3: memref<1x128xf32, #tpu.memory_space<vmem>>, %arg4: memref<128x512xf32, #tpu.memory_space<vmem>>, %arg5: memref<1x512xf32, #tpu.memory_space<vmem>>, %arg6: memref<8x512xf32, #tpu.memory_space<vmem>>) attributes {dimension_semantics = [#tpu.dimension_semantics<parallel>], iteration_bounds = array<i64: 2>, scalar_prefetch = 0 : i64, scratch_operands = 0 : i64, tpu.core_type = #tpu.core_type<tc>, window_params = [{transform_indices = @transform_0, window_bounds = array<i64: 8, 16>}, {pipeline_mode = #tpu.pipeline_mode<synchronous>, transform_indices = @transform_1, window_bounds = array<i64: 16, 128>}, {pipeline_mode = #tpu.pipeline_mode<synchronous>, transform_indices = @transform_2, window_bounds = array<i64: 1, 128>}, {pipeline_mode = #tpu.pipeline_mode<synchronous>, transform_indices = @transform_3, window_bounds = array<i64: 128, 512>}, {pipeline_mode = #tpu.pipeline_mode<synchronous>, transform_indices = @transform_4, window_bounds = array<i64: 1, 512>}, {transform_indices = @transform_5, window_bounds = array<i64: 8, 512>}]} {
    %c0 = arith.constant 0 : index
    %c0_0 = arith.constant 0 : index
    %0 = vector.load %arg1[%c0, %c0_0] : memref<8x16xf32, #tpu.memory_space<vmem>>, vector<8x16xf32>
    %cst = arith.constant 0.0027397261 : f32
    %1 = vector.broadcast %cst : f32 to vector<8x16xf32>
    %2 = arith.mulf %0, %1 : vector<8x16xf32>
    %cst_1 = arith.constant 0.000000e+00 : f32
    %cst_2 = arith.constant 1.000000e+00 : f32
    %3 = vector.broadcast %cst_1 : f32 to vector<8x16xf32>
    %4 = arith.maximumf %3, %2 : vector<8x16xf32>
    %5 = vector.broadcast %cst_2 : f32 to vector<8x16xf32>
    %6 = arith.minimumf %5, %4 : vector<8x16xf32>
    %c0_3 = arith.constant 0 : index
    %c0_4 = arith.constant 0 : index
    %7 = vector.load %arg2[%c0_3, %c0_4] : memref<16x128xf32, #tpu.memory_space<vmem>>, vector<16x128xf32>
    %cst_5 = arith.constant dense<0.000000e+00> : vector<8x128xf32>
    %8 = tpu.matmul %6, %7, %cst_5 {dimension_numbers = #tpu.dot_dimension_numbers<[1], [0], [0], [1], [0, 0, 1, 1], [], []>} : vector<8x16xf32>, vector<16x128xf32>, vector<8x128xf32> -> vector<8x128xf32>
    %c0_6 = arith.constant 0 : index
    %c0_7 = arith.constant 0 : index
    %9 = vector.load %arg3[%c0_6, %c0_7] : memref<1x128xf32, #tpu.memory_space<vmem>>, vector<1x128xf32>
    %10 = vector.broadcast %9 : vector<1x128xf32> to vector<8x128xf32>
    %11 = arith.addf %8, %10 : vector<8x128xf32>
    %cst_8 = arith.constant 0.000000e+00 : f32
    %12 = vector.broadcast %cst_8 : f32 to vector<8x128xf32>
    %13 = arith.maximumf %11, %12 : vector<8x128xf32>
    %c0_9 = arith.constant 0 : index
    %c0_10 = arith.constant 0 : index
    %14 = vector.load %arg4[%c0_9, %c0_10] : memref<128x512xf32, #tpu.memory_space<vmem>>, vector<128x512xf32>
    %cst_11 = arith.constant dense<0.000000e+00> : vector<8x512xf32>
    %15 = tpu.matmul %13, %14, %cst_11 {dimension_numbers = #tpu.dot_dimension_numbers<[1], [0], [0], [1], [0, 0, 1, 1], [], []>} : vector<8x128xf32>, vector<128x512xf32>, vector<8x512xf32> -> vector<8x512xf32>
    %c0_12 = arith.constant 0 : index
    %c0_13 = arith.constant 0 : index
    %16 = vector.load %arg5[%c0_12, %c0_13] : memref<1x512xf32, #tpu.memory_space<vmem>>, vector<1x512xf32>
    %17 = vector.broadcast %16 : vector<1x512xf32> to vector<8x512xf32>
    %18 = arith.addf %15, %17 : vector<8x512xf32>
    %c0_14 = arith.constant 0 : index
    %c0_15 = arith.constant 0 : index
    %19 = vector.load %arg6[%c0_14, %c0_15] : memref<8x512xf32, #tpu.memory_space<vmem>>, vector<8x512xf32>
    tpu.vector_store %arg6[%c0_14, %c0_15], %18 {strides = array<i32>} : memref<8x512xf32, #tpu.memory_space<vmem>>, vector<8x512xf32>,
    return
  }
  func.func @transform_0(%arg0: i32) -> (i32, i32) {
    %c0_i32 = arith.constant 0 : i32
    %c0_i32_0 = arith.constant 0 : i32
    return %arg0, %c0_i32 : i32, i32
  }
  func.func @transform_1(%arg0: i32) -> (i32, i32) {
    %c0_i32 = arith.constant 0 : i32
    %c0_i32_0 = arith.constant 0 : i32
    %c0_i32_1 = arith.constant 0 : i32
    return %c0_i32, %c0_i32_0 : i32, i32
  }
  func.func @transform_2(%arg0: i32) -> (i32, i32) {
    %c0_i32 = arith.constant 0 : i32
    %c0_i32_0 = arith.constant 0 : i32
    %c0_i32_1 = arith.constant 0 : i32
    return %c0_i32, %c0_i32_0 : i32, i32
  }
  func.func @transform_3(%arg0: i32) -> (i32, i32) {
    %c0_i32 = arith.constant 0 : i32
    %c0_i32_0 = arith.constant 0 : i32
    %c0_i32_1 = arith.constant 0 : i32
    return %c0_i32, %c0_i32_0 : i32, i32
  }
  func.func @transform_4(%arg0: i32) -> (i32, i32) {
    %c0_i32 = arith.constant 0 : i32
    %c0_i32_0 = arith.constant 0 : i32
    %c0_i32_1 = arith.constant 0 : i32
    return %c0_i32, %c0_i32_0 : i32, i32
  }
  func.func @transform_5(%arg0: i32) -> (i32, i32) {
    %c0_i32 = arith.constant 0 : i32
    %c0_i32_0 = arith.constant 0 : i32
    return %arg0, %c0_i32 : i32, i32
  }
}

</mosaic_0001>

<bundles_post_ra>
// kernel: _lambda_.1
= control target key start
LH: loop header
LB: loop body
LE: loop exit
PB: predicated region body
PF: predicated region fallthrough
CT: control target
= control target key end

     0   :  { %10 = vsyncpa [#allocation3], 0  ;;  %s745_s18 = smov 0   ;;  %s805_s0 = inlined_call_operand.vmem [shape: f32[16,16], index: 0, kind: input, shape index: {}]   ;;  %s806_s1 = inlined_call_operand.vmem [shape: f32[16,128], index: 1, kind: input, shape index: {}]   ;;  %s807_s2 = inlined_call_operand.vmem [shape: f32[1,128], index: 2, kind: input, shape index: {}]   ;;  %s808_s3 = inlined_call_operand.hbm [shape: f32[128,512], index: 3, kind: input, shape index: {}]   ;;  %s809_s4 = inlined_call_operand.vmem [shape: f32[1,512], index: 4, kind: input, shape index: {}]   ;;  %s810_s5 = inlined_call_operand.vmem [shape: f32[16,512], index: 5, kind: output, shape index: {}]  }
   0x1 LB: > { %s751_s19 = sadd.s32 4294967295, %s708_s18   ;;  %p626_p0 = scmp.ge.s32.totalorder %s708_s18, 1  ;;  %s708_s18 = sphi %s745_s18, %s16_s18  }
   0x2   : > { %p157_p1 = scmp.lt.s32.totalorder %s708_s18, 3  ;;  %s710_s20 = smov [#allocation2]  }
   0x3   : > { %s175_s21 = sshll.u32 %s710_s20, 4  ;;  %p657_p3 = scmp.eq.s32.totalorder %s751_s19, 0  ;;  %s176_s21 = int_to_ptr.vmem [resolvable:$true] %s175_s21 }
   0x4   : > { %p755_p2 = pnand %p626_p0, %p157_p1  ;;  %s683_s23 = scalar_lea.vmem %s176_s21, 8192 }
   0x5   : > { %p684_p7 = scmp.ne.s32.totalorder %s176_s21, %s683_s23  ;;  %p691_p10 = scmp.lt.s32.totalorder %s176_s21, %s176_s21 }
   0x6   : > { %p653_p4 = pneg %p755_p2  ;;  %p692_p11 = scmp.lt.s32.totalorder %s683_s23, %s683_s23 }
   0x8   : > { %p654_p5 = pnand %p657_p3, %p653_p4  ;;  %p693_p12 = por %p692_p11, %p691_p10 }
   0xa   : > { %p674_p6 = pneg %p654_p5 }
   0xc   : > { %p686_p8 = pnand %p684_p7, %p674_p6 }
   0xe   : > { %p687_p9 = pneg %p686_p8 }
  0x10   : > { %p694_p13 = pnand %p693_p12, %p687_p9 }
  0x12   : > { %697 = shalt.err (!%p694_p13)
}
  0x13   : > { %s711_s24 = smov 512   ;;  %s712_s25 = smov 32  }
  0x14   : > { %656 = dma.hbm_to_vmem [thread:$0]  (!%p654_p5), %s808_s3, 8192, %s176_s21, [#allocation3], %s711_s24, %s711_s24, %s712_s25  }
  0x15   : > { %201 = sbr.rel (%p755_p2) target bundleno = 434 (0x1b2), region = 40 }
  0x1a   : > { %703 = dma.done.wait (%p657_p3), [#allocation3], 8192  }
  0x1b   : > { %705 = vsyncadd (%p657_p3), [#allocation3], 4294959104  ;;  %p228_p0 = scmp.lt.s32.totalorder %s751_s19, 1  ;;  %v713_v0 = vmov 0.0   ;;  %vm714_vm0 = vmmov 0   ;;  %v242_v1 = vld [vmem:[%s806_s1 + $0x8] sm:$0xff] }
  0x1c   : > { %642 = vmatprep.subr.mxu0 %v713_v0  ;;  %646 = vmatprep.mubr.msk.f32.mxu0 %vm714_vm0, %v713_v0  ;;  %v241_v2 = vld [vmem:[%s806_s1] sm:$0xff]  ;;  %v386_v5 = vld [vmem:[#allocation2 + $0x1e8] sm:$0xff]  ;;  %v388_v6 = vld [vmem:[#allocation2 + $0x1f8] sm:$0xff]  ;;  %vm250_vm1 = vcmask 130048  }
  0x1d   : > { %s813_s19 = smov (!%p228_p0, %s751_s19), 1  ;;  %475 = vmatprep.mubr.f32.mxu1 %v713_v0  ;;  %643 = vmatpush3.msra.mxu0 %v242_v1  ;;  %v385_v7 = vld [vmem:[#allocation2 + $0x1e0] sm:$0xff]  ;;  %v382_v8 = vld [vmem:[#allocation2 + $0x1c8] sm:$0xff]  ;;  %v387_v14 = vld [vmem:[#allocation2 + $0x1f0] sm:$0xff] }
  0x1e   : > { %s631_s28 = sshll.u32 %s813_s19, 3  ;;  %644 = vmatprep.subr.mxu0 %v713_v0  ;;  %411 = vmatprep.subr.mxu1 %v386_v5  ;;  %v381_v10 = vld [vmem:[#allocation2 + $0x1c0] sm:$0xff]  ;;  %v378_v11 = vld [vmem:[#allocation2 + $0x1a8] sm:$0xff]  ;;  %v384_v16 = vld [vmem:[#allocation2 + $0x1d8] sm:$0xff]  ;;  %s638_s15 = sshll.u32 %s813_s19, 5 }
  0x1f   : > { %s231_s6 = scalar_lea.vmem %s805_s0, %s631_s28  ;;  %645 = vmatpush3.msra.mxu0 %v241_v2  ;;  %412 = vmatpush1.msra.mxu1 %v385_v7  ;;  %v377_v12 = vld [vmem:[#allocation2 + $0x1a0] sm:$0xff]  ;;  %v374_v15 = vld [vmem:[#allocation2 + $0x188] sm:$0xff]  ;;  %v383_v18 = vld [vmem:[#allocation2 + $0x1d0] sm:$0xff]  ;;  %s236_s20 = scalar_lea.vmem %s810_s5, %s638_s15 }
  0x20   : > { %v237_v3 = vld [vmem:[%s231_s6] sm:$0xff]  ;;  %482 = vmatprep.subr.mxu0 %v388_v6  ;;  %413 = vmatprep.subr.mxu1 %v382_v8  ;;  %v370_v19 = vld [vmem:[#allocation2 + $0x168] sm:$0xff]  ;;  %v380_v20 = vld [vmem:[#allocation2 + $0x1b8] sm:$0xff] }
  0x21   : > { %v238_v4 = vmul.f32 0.002739726, %v237_v3  ;;  %414 = vmatpush1.msra.mxu1 %v381_v10  ;;  %v373_v17 = vld [vmem:[#allocation2 + $0x180] sm:$0xff]  ;;  %v379_v22 = vld [vmem:[#allocation2 + $0x1b0] sm:$0xff]  ;;  %v366_v23 = vld [vmem:[#allocation2 + $0x148] sm:$0xff] }
  0x22   : > { %415 = vmatprep.subr.mxu1 %v378_v11  ;;  %v369_v21 = vld [vmem:[#allocation2 + $0x160] sm:$0xff]  ;;  %v376_v24 = vld [vmem:[#allocation2 + $0x198] sm:$0xff]  ;;  %v375_v26 = vld [vmem:[#allocation2 + $0x190] sm:$0xff] }
  0x23   : > { %v239_v9 = vmax.f32 %v238_v4, 0.0  ;;  %416 = vmatpush1.msra.mxu1 %v377_v12  ;;  %v365_v25 = vld [vmem:[#allocation2 + $0x140] sm:$0xff]  ;;  %v362_v27 = vld [vmem:[#allocation2 + $0x128] sm:$0xff]  ;;  %v372_v28 = vld [vmem:[#allocation2 + $0x178] sm:$0xff]  ;;  %v391_v12 = vlaneseq }
  0x24   : > { %417 = vmatprep.subr.mxu1 %v374_v15  ;;  %v361_v29 = vld [vmem:[#allocation2 + $0x120] sm:$0xff]  ;;  %v371_v30 = vld [vmem:[#allocation2 + $0x170] sm:$0xff]  ;;  %v358_v31 = vld [vmem:[#allocation2 + $0x108] sm:$0xff] }
  0x25   : > { %v240_v13 = vmin.f32 %v239_v9, 1.0  ;;  %418 = vmatpush1.msra.mxu1 %v373_v17  ;;  %v368_v32 = vld [vmem:[#allocation2 + $0x158] sm:$0xff]  ;;  %v357_v33 = vld [vmem:[#allocation2 + $0x100] sm:$0xff]  ;;  %v367_v34 = vld [vmem:[#allocation2 + $0x150] sm:$0xff] }
  0x26   : > { %419 = vmatprep.subr.mxu1 %v370_v19  ;;  %v354_v35 = vld [vmem:[#allocation2 + $0xe8] sm:$0xff]  ;;  %v364_v36 = vld [vmem:[#allocation2 + $0x138] sm:$0xff]  ;;  %v353_v37 = vld [vmem:[#allocation2 + $0xe0] sm:$0xff] }
  0x27   : > { %647 = vmatmul.mubr.msk.f32.vlgmr.msra.gmra.mxu0 %vm250_vm1, %v240_v13  ;;  %420 = vmatpush1.msra.mxu1 %v369_v21  ;;  %v363_v38 = vld [vmem:[#allocation2 + $0x130] sm:$0xff]  ;;  %v350_v39 = vld [vmem:[#allocation2 + $0xc8] sm:$0xff]  ;;  %v360_v40 = vld [vmem:[#allocation2 + $0x118] sm:$0xff]  ;;  %v392_v13 = vshrl.u32 %v391_v12, 7 }
  0x28   : > { %483 = vmatpush1.msra.mxu0 %v387_v14  ;;  %421 = vmatprep.subr.mxu1 %v366_v23  ;;  %v349_v41 = vld [vmem:[#allocation2 + $0xc0] sm:$0xff]  ;;  %v359_v42 = vld [vmem:[#allocation2 + $0x110] sm:$0xff]  ;;  %v346_v43 = vld [vmem:[#allocation2 + $0xa8] sm:$0xff] }
  0x29   : > { %484 = vmatprep.subr.mxu0 %v384_v16  ;;  %422 = vmatpush1.msra.mxu1 %v365_v25  ;;  %v356_v44 = vld [vmem:[#allocation2 + $0xf8] sm:$0xff]  ;;  %v345_v45 = vld [vmem:[#allocation2 + $0xa0] sm:$0xff]  ;;  %v355_v46 = vld [vmem:[#allocation2 + $0xf0] sm:$0xff]  ;;  %v393_v14 = vsub.s32 0, %v392_v13  ;;  %v401_v15 = vsub.s32 2, %v392_v13  ;;  %v397_v17 = vsub.s32 1, %v392_v13 }
  0x2a   : > { %485 = vmatpush1.msra.mxu0 %v383_v18  ;;  %423 = vmatprep.subr.mxu1 %v362_v27  ;;  %v342_v47 = vld [vmem:[#allocation2 + $0x88] sm:$0xff]  ;;  %v352_v48 = vld [vmem:[#allocation2 + $0xd8] sm:$0xff]  ;;  %v341_v49 = vld [vmem:[#allocation2 + $0x80] sm:$0xff]  ;;  %v405_v18 = vsub.s32 3, %v392_v13 }
  0x2b   : > { %486 = vmatprep.subr.mxu0 %v380_v20  ;;  %424 = vmatpush1.msra.mxu1 %v361_v29  ;;  %v351_v50 = vld [vmem:[#allocation2 + $0xd0] sm:$0xff]  ;;  %v338_v51 = vld [vmem:[#allocation2 + $0x68] sm:$0xff]  ;;  %v348_v52 = vld [vmem:[#allocation2 + $0xb8] sm:$0xff] }
  0x2c   : > { %487 = vmatpush1.msra.mxu0 %v379_v22  ;;  %425 = vmatprep.subr.mxu1 %v358_v31  ;;  %v337_v53 = vld [vmem:[#allocation2 + $0x60] sm:$0xff]  ;;  %v347_v54 = vld [vmem:[#allocation2 + $0xb0] sm:$0xff]  ;;  %v334_v55 = vld [vmem:[#allocation2 + $0x48] sm:$0xff] }
  0x2d   : > { %488 = vmatprep.subr.mxu0 %v376_v24  ;;  %426 = vmatpush1.msra.mxu1 %v357_v33  ;;  %v344_v56 = vld [vmem:[#allocation2 + $0x98] sm:$0xff]  ;;  %v343_v57 = vld [vmem:[#allocation2 + $0x90] sm:$0xff]  ;;  %v333_v61 = vld [vmem:[#allocation2 + $0x40] sm:$0xff] }
  0x2e   : > { %489 = vmatpush1.msra.mxu0 %v375_v26  ;;  %427 = vmatprep.subr.mxu1 %v354_v35  ;;  %v340_v58 = vld [vmem:[#allocation2 + $0x78] sm:$0xff]  ;;  %v339_v59 = vld [vmem:[#allocation2 + $0x70] sm:$0xff]  ;;  %v330_v63 = vld [vmem:[#allocation2 + $0x28] sm:$0xff] }
  0x2f   : > { %490 = vmatprep.subr.mxu0 %v372_v28  ;;  %428 = vmatpush1.msra.mxu1 %v353_v37  ;;  %v336_v60 = vld [vmem:[#allocation2 + $0x58] sm:$0xff]  ;;  %v335_v62 = vld [vmem:[#allocation2 + $0x50] sm:$0xff]  ;;  %v329_v2 = vld [vmem:[#allocation2 + $0x20] sm:$0xff] }
  0x30   : > { %491 = vmatpush1.msra.mxu0 %v371_v30  ;;  %429 = vmatprep.subr.mxu1 %v350_v39  ;;  %v332_v1 = vld [vmem:[#allocation2 + $0x38] sm:$0xff]  ;;  %v331_v3 = vld [vmem:[#allocation2 + $0x30] sm:$0xff]  ;;  %v326_v4 = vld [vmem:[#allocation2 + $0x8] sm:$0xff] }
  0x31   : > { %492 = vmatprep.subr.mxu0 %v368_v32  ;;  %430 = vmatpush1.msra.mxu1 %v349_v41  ;;  %v328_v5 = vld [vmem:[#allocation2 + $0x18] sm:$0xff]  ;;  %v327_v6 = vld [vmem:[#allocation2 + $0x10] sm:$0xff]  ;;  %v634_v7 = vld [vmem:[%s807_s2] ss:$0 sm:$0xff] }
  0x32   : > { %493 = vmatpush1.msra.mxu0 %v367_v34  ;;  %431 = vmatprep.subr.mxu1 %v346_v43  ;;  %v389_v16 = vld [vmem:[%s809_s4] sm:$0xf] }
  0x33   : > { %494 = vmatprep.subr.mxu0 %v364_v36  ;;  %432 = vmatpush1.msra.mxu1 %v345_v45  ;;  %v394_v19 = vrot.slane %v389_v16, %v393_v14  ;;  %v402_v20 = vrot.slane %v389_v16, %v401_v15  ;;  %v398_v21 = vrot.slane %v389_v16, %v397_v17 }
  0x34   : > { %495 = vmatpush1.msra.mxu0 %v363_v38  ;;  %433 = vmatprep.subr.mxu1 %v342_v47  ;;  %v406_v22 = vrot.slane %v389_v16, %v405_v18 }
  0x35   : > { %496 = vmatprep.subr.mxu0 %v360_v40  ;;  %434 = vmatpush1.msra.mxu1 %v341_v49 }
  0x36   : > { %497 = vmatpush1.msra.mxu0 %v359_v42  ;;  %435 = vmatprep.subr.mxu1 %v338_v51 }
  0x37   : > { %498 = vmatprep.subr.mxu0 %v356_v44  ;;  %436 = vmatpush1.msra.mxu1 %v337_v53 }
  0x38   : > { %499 = vmatpush1.msra.mxu0 %v355_v46  ;;  %437 = vmatprep.subr.mxu1 %v334_v55 }
  0x39   : > { %500 = vmatprep.subr.mxu0 %v352_v48  ;;  %546 = vmatprep.mubr.f32.mxu0 %v713_v0  ;;  %v325_v0 = vld [vmem:[#allocation2] sm:$0xff] }
  0x3a   : > { %501 = vmatpush1.msra.mxu0 %v351_v50  ;;  %438 = vmatpush1.msra.mxu1 %v333_v61 }
  0x3b   : > { %502 = vmatprep.subr.mxu0 %v348_v52  ;;  %439 = vmatprep.subr.mxu1 %v330_v63 }
  0x3c   : > { %503 = vmatpush1.msra.mxu0 %v347_v54  ;;  %440 = vmatpush1.msra.mxu1 %v329_v2 }
  0x3d   : > { %504 = vmatprep.subr.mxu0 %v344_v56  ;;  %441 = vmatprep.subr.mxu1 %v326_v4 }
  0x3e   : > { %505 = vmatpush1.msra.mxu0 %v343_v57  ;;  %442 = vmatpush1.msra.mxu1 %v325_v0 }
  0x3f   : > { %506 = vmatprep.subr.mxu0 %v340_v58 }
  0x40   : > { %507 = vmatpush1.msra.mxu0 %v339_v59 }
  0x41   : > { %508 = vmatprep.subr.mxu0 %v336_v60 }
  0x42   : > { %509 = vmatpush1.msra.mxu0 %v335_v62 }
  0x43   : > { %510 = vmatprep.subr.mxu0 %v332_v1 }
  0x44   : > { %511 = vmatpush1.msra.mxu0 %v331_v3 }
  0x45   : > { %512 = vmatprep.subr.mxu0 %v328_v5 }
  0x46   : > { %513 = vmatpush1.msra.mxu0 %v327_v6 }
  0xe7   : > { %v320_v8 = vpop.f32.mrf.mxu0 }
  0xe8   : > { %v321_v9 = vadd.f32 %v634_v7, %v320_v8 }
  0xe9   : > { %v648_v10 = vpop.f32.mrf.mxu0 }
  0xea   : > { %v324_v11 = vmax.f32 %v321_v9, 0.0 }
  0xec   : > { %476 = vmatmul.mubr.f32.vlgmr.msra.gmra.mxu1 %v324_v11  ;;  %547 = vmatmul.mubr.f32.vlgmr.msra.gmra.mxu0 %v324_v11 }
 0x1ac   : > { %v477_v23 = vpop.f32.mrf.mxu1  ;;  %v548_v24 = vpop.f32.mrf.mxu0 }
 0x1ad   : > { %v478_v25 = vadd.f32 %v477_v23, %v394_v19  ;;  %v549_v26 = vadd.f32 %v548_v24, %v402_v20 }
 0x1ae   : > { %v479_v27 = vpop.f32.mrf.mxu1  ;;  %v550_v28 = vpop.f32.mrf.mxu0 }
 0x1af   : > { %553 = vst [vmem:[%s236_s20] sm:$0xff] %v478_v25  ;;  %555 = vst [vmem:[%s236_s20 + $0x10] sm:$0xff] %v549_v26  ;;  %v480_v29 = vadd.f32 %v479_v27, %v398_v21  ;;  %v551_v30 = vadd.f32 %v550_v28, %v406_v22 }
 0x1b1   : > { %554 = vst [vmem:[%s236_s20 + $0x8] sm:$0xff] %v480_v29  ;;  %556 = vst [vmem:[%s236_s20 + $0x18] sm:$0xff] %v551_v30 }
 0x1b2 PF: > { %s16_s18 = sadd.s32 1, %s708_s18  }
 0x1b3   : > { %p13_p1 = scmp.ge.s32.totalorder %s16_s18, 4  }
 0x1b5   :  { %15 = sbr.rel (!%p13_p1) target bundleno = 1 (0x1), region = 75 }
 0x1ba   :  { %578 = vsyncpa [#allocation3], 1 }
 0x1bb   :  { %580 = vsyncpa [#allocation3 + $0x1], 1 }

</bundles_post_ra>
